<compile_context>
chip_gen: v7x
topology: tpu7x:2x2x1
jax: 0.10.0
libtpu: 0.0.40
codegen_flags: <defaults>
</compile_context>

<pallas_src>
import jax
import jax.numpy as jnp
from jax.experimental import pallas as pl
from jax.experimental.pallas import tpu as pltpu


RENORM_MAXNORM = 1e-5   # torch.renorm(p=2, dim=1, maxnorm=1e-5)
RENORM_EPS = 1e-7       # torch uses maxnorm / (norm + 1e-7)
RENORM_MUL = 1e5


def _modified_kernel(x_ref, w_ref, label_ref, out_ref, loss_ref):
    B, F = x_ref.shape
    _, C = w_ref.shape

    x = x_ref[...]                      # (B, F) f32
    w = w_ref[...]                      # (F, C) f32
    labels = label_ref[...]             # (B, 1) int32

    # --- weight.renorm(2, dim=1, maxnorm=1e-5).mul(1e5) -------------------
    # Per-column L2 norm.  F is tiny (2), so the axis-0 reduction is written
    # as an unrolled VPU add of the rows instead of an XLU sublane reduce.
    w_rows = [w[f:f + 1, :] for f in range(F)]          # list of (1, C)
    col_sq = w_rows[0] * w_rows[0]
    for f in range(1, F):
        col_sq = col_sq + w_rows[f] * w_rows[f]
    col_norm = jnp.sqrt(col_sq)                         # (1, C)
    # Faithful to torch.renorm: strict '>' test and +1e-7 stabilizer.
    scale = jnp.where(col_norm > RENORM_MAXNORM,
                      RENORM_MAXNORM / (col_norm + RENORM_EPS),
                      jnp.ones_like(col_norm))
    scale = scale * RENORM_MUL                          # fold the .mul(1e5)

    # --- out = x @ ww, expanded as F VPU broadcast-FMAs (no MXU round-trip) -
    logits = x[:, 0:1] * (w_rows[0] * scale)            # (B,1)*(1,C) -> (B,C)
    for f in range(1, F):
        logits = logits + x[:, f:f + 1] * (w_rows[f] * scale)
    out_ref[...] = logits

    # --- F.cross_entropy(out, label)  (mean reduction) ---------------------
    m = jnp.max(logits, axis=-1, keepdims=True)                         # (B, 1)
    shifted = logits - m
    lse = jnp.log(jnp.sum(jnp.exp(shifted), axis=-1, keepdims=True)) + m  # (B,1)

    cls_idx = jax.lax.broadcasted_iota(jnp.int32, logits.shape, 1)      # (B, C)
    onehot = (cls_idx == labels).astype(jnp.float32)                    # (B, C)
    picked = jnp.sum(onehot * logits, axis=-1, keepdims=True)           # (B, 1)

    nll = lse - picked                                                  # (B, 1)
    loss_ref[0, 0] = jnp.mean(nll)                      # scalar store to SMEM


def modified_forward(x, weight, label):
    """x: (B, F) f32, weight: (F, C) f32, label: (B,) int -> (out (B,C), loss scalar)."""
    B, F = x.shape
    F2, C = weight.shape
    assert F == F2
    label2d = label.astype(jnp.int32).reshape(B, 1)

    out, loss = pl.pallas_call(
        _modified_kernel,
        out_shape=(
            jax.ShapeDtypeStruct((B, C), jnp.float32),
            jax.ShapeDtypeStruct((1, 1), jnp.float32),
        ),
        in_specs=[
            pl.BlockSpec((B, F), lambda: (0, 0)),
            pl.BlockSpec((F, C), lambda: (0, 0)),
            pl.BlockSpec((B, 1), lambda: (0, 0)),
        ],
        out_specs=(
            pl.BlockSpec((B, C), lambda: (0, 0)),
            pl.BlockSpec(memory_space=pltpu.MemorySpace.SMEM),   # scalar loss
        ),
    )(x, weight, label2d)
    return out, loss[0, 0]


def init_weight(key):
    """Deterministic stand-in for the PyTorch __init__:
    xavier_uniform_ -> uniform_(-1, 1) -> renorm_(2, 1, 1e-5) -> mul_(1e5).
    (The xavier init is immediately overwritten by uniform_, so only the
    uniform + renorm*1e5 matters.)"""
    w = jax.random.uniform(key, (2, 10), dtype=jnp.float32, minval=-1.0, maxval=1.0)
    col_norm = jnp.sqrt(jnp.sum(w * w, axis=0, keepdims=True))
    scale = jnp.where(col_norm > RENORM_MAXNORM,
                      RENORM_MAXNORM / (col_norm + RENORM_EPS),
                      jnp.ones_like(col_norm))
    return (w * scale) * RENORM_MUL


if __name__ == "__main__":
    key = jax.random.PRNGKey(0)
    k_w, k_x, k_l = jax.random.split(key, 3)

    B, F, C = 8, 2, 10
    weight = init_weight(k_w)                                           # (2, 10)
    x = jax.random.normal(k_x, (B, F), dtype=jnp.float32)               # (8, 2)
    label = jax.random.randint(k_l, (B,), 0, C, dtype=jnp.int32)        # (8,)

    out, loss = modified_forward(x, weight, label)
    jax.block_until_ready((out, loss))

    # Pure-JAX reference check (same math, outside Pallas).
    col_norm = jnp.sqrt(jnp.sum(weight * weight, axis=0, keepdims=True))
    scale = jnp.where(col_norm > RENORM_MAXNORM,
                      RENORM_MAXNORM / (col_norm + RENORM_EPS), 1.0)
    ww = weight * scale * RENORM_MUL
    logits_ref = x @ ww
    logp = jax.nn.log_softmax(logits_ref, axis=-1)
    loss_ref = -jnp.mean(logp[jnp.arange(B), label])
    assert jnp.allclose(out, logits_ref, atol=1e-4, rtol=1e-4)
    assert jnp.allclose(loss, loss_ref, atol=1e-4, rtol=1e-4)

    print("KERNEL_OK")
</pallas_src>

<mosaic_0001>
module attributes {stable_mosaic.version = 11 : i64} {
  func.func @_modified_kernel(%arg0: memref<8x2xf32, #tpu.memory_space<vmem>>, %arg1: memref<2x10xf32, #tpu.memory_space<vmem>>, %arg2: memref<8x1xi32, #tpu.memory_space<vmem>>, %arg3: memref<8x10xf32, #tpu.memory_space<vmem>>, %arg4: memref<1x1xf32, #tpu.memory_space<smem>>) attributes {dimension_semantics = [], scalar_prefetch = 0 : i64, scratch_operands = 0 : i64, tpu.core_type = #tpu.core_type<tc>} {
    %c0 = arith.constant 0 : index
    %c0_0 = arith.constant 0 : index
    %0 = vector.load %arg0[%c0, %c0_0] : memref<8x2xf32, #tpu.memory_space<vmem>>, vector<8x2xf32>
    %c0_1 = arith.constant 0 : index
    %c0_2 = arith.constant 0 : index
    %1 = vector.load %arg1[%c0_1, %c0_2] : memref<2x10xf32, #tpu.memory_space<vmem>>, vector<2x10xf32>
    %c0_3 = arith.constant 0 : index
    %c0_4 = arith.constant 0 : index
    %2 = vector.load %arg2[%c0_3, %c0_4] : memref<8x1xi32, #tpu.memory_space<vmem>>, vector<8x1xi32>
    %3 = vector.extract_strided_slice %1 {offsets = [0, 0], sizes = [1, 10], strides = [1, 1]} : vector<2x10xf32> to vector<1x10xf32>
    %4 = vector.extract_strided_slice %1 {offsets = [1, 0], sizes = [1, 10], strides = [1, 1]} : vector<2x10xf32> to vector<1x10xf32>
    %5 = arith.mulf %3, %3 : vector<1x10xf32>
    %6 = arith.mulf %4, %4 : vector<1x10xf32>
    %7 = arith.addf %5, %6 : vector<1x10xf32>
    %8 = math.sqrt %7 : vector<1x10xf32>
    %cst = arith.constant 9.99999974E-6 : f32
    %9 = vector.broadcast %cst : f32 to vector<1x10xf32>
    %10 = arith.cmpf ogt, %8, %9 : vector<1x10xf32>
    %cst_5 = arith.constant 1.000000e-07 : f32
    %11 = vector.broadcast %cst_5 : f32 to vector<1x10xf32>
    %12 = arith.addf %8, %11 : vector<1x10xf32>
    %cst_6 = arith.constant 9.99999974E-6 : f32
    %13 = vector.broadcast %cst_6 : f32 to vector<1x10xf32>
    %14 = arith.divf %13, %12 : vector<1x10xf32>
    %cst_7 = arith.constant 1.000000e+00 : f32
    %15 = vector.broadcast %cst_7 : f32 to vector<1x10xf32>
    %16 = arith.select %10, %14, %15 : vector<1x10xi1>, vector<1x10xf32>
    %cst_8 = arith.constant 1.000000e+05 : f32
    %17 = vector.broadcast %cst_8 : f32 to vector<1x10xf32>
    %18 = arith.mulf %16, %17 : vector<1x10xf32>
    %19 = vector.extract_strided_slice %0 {offsets = [0, 0], sizes = [8, 1], strides = [1, 1]} : vector<8x2xf32> to vector<8x1xf32>
    %20 = arith.mulf %3, %18 : vector<1x10xf32>
    %21 = vector.broadcast %19 : vector<8x1xf32> to vector<8x10xf32>
    %22 = vector.broadcast %20 : vector<1x10xf32> to vector<8x10xf32>
    %23 = arith.mulf %21, %22 : vector<8x10xf32>
    %24 = vector.extract_strided_slice %0 {offsets = [0, 1], sizes = [8, 1], strides = [1, 1]} : vector<8x2xf32> to vector<8x1xf32>
    %25 = arith.mulf %4, %18 : vector<1x10xf32>
    %26 = vector.broadcast %24 : vector<8x1xf32> to vector<8x10xf32>
    %27 = vector.broadcast %25 : vector<1x10xf32> to vector<8x10xf32>
    %28 = arith.mulf %26, %27 : vector<8x10xf32>
    %29 = arith.addf %23, %28 : vector<8x10xf32>
    %c0_9 = arith.constant 0 : index
    %c0_10 = arith.constant 0 : index
    %30 = vector.load %arg3[%c0_9, %c0_10] : memref<8x10xf32, #tpu.memory_space<vmem>>, vector<8x10xf32>
    tpu.vector_store %arg3[%c0_9, %c0_10], %29 {strides = array<i32>} : memref<8x10xf32, #tpu.memory_space<vmem>>, vector<8x10xf32>,
    %cst_11 = arith.constant dense<0xFF800000> : vector<8xf32>
    %31 = vector.multi_reduction <maximumf>, %29, %cst_11 [1] : vector<8x10xf32> to vector<8xf32>
    %32 = vector.shape_cast %31 : vector<8xf32> to vector<8x1xf32>
    %33 = vector.broadcast %32 : vector<8x1xf32> to vector<8x10xf32>
    %34 = arith.subf %29, %33 : vector<8x10xf32>
    %35 = math.exp %34 : vector<8x10xf32>
    %cst_12 = arith.constant dense<0.000000e+00> : vector<8xf32>
    %36 = vector.multi_reduction <add>, %35, %cst_12 [1] : vector<8x10xf32> to vector<8xf32>
    %37 = vector.shape_cast %36 : vector<8xf32> to vector<8x1xf32>
    %38 = math.log %37 : vector<8x1xf32>
    %39 = arith.addf %38, %32 : vector<8x1xf32>
    %40 = tpu.iota {dimensions = array<i32: 1>} : vector<8x10xi32>
    %41 = vector.broadcast %2 : vector<8x1xi32> to vector<8x10xi32>
    %42 = arith.cmpi eq, %40, %41 : vector<8x10xi32>
    %43 = arith.extui %42 : vector<8x10xi1> to vector<8x10xi32>
    %44 = arith.sitofp %43 : vector<8x10xi32> to vector<8x10xf32>
    %45 = arith.mulf %44, %29 : vector<8x10xf32>
    %cst_13 = arith.constant dense<0.000000e+00> : vector<8xf32>
    %46 = vector.multi_reduction <add>, %45, %cst_13 [1] : vector<8x10xf32> to vector<8xf32>
    %47 = vector.shape_cast %46 : vector<8xf32> to vector<8x1xf32>
    %48 = arith.subf %39, %47 : vector<8x1xf32>
    %49 = vector.shape_cast %48 : vector<8x1xf32> to vector<1x8x1xf32>
    %cst_14 = arith.constant dense<0.000000e+00> : vector<1xf32>
    %50 = vector.multi_reduction <add>, %49, %cst_14 [1, 2] : vector<1x8x1xf32> to vector<1xf32>
    %51 = vector.shape_cast %50 : vector<1xf32> to vector<1x1x1xf32>
    %52 = vector.extract %51[0, 0, 0] : f32 from vector<1x1x1xf32>
    %cst_15 = arith.constant 8.000000e+00 : f32
    %53 = arith.divf %52, %cst_15 : f32
    %c0_16 = arith.constant 0 : index
    %c0_17 = arith.constant 0 : index
    %54 = memref.load %arg4[%c0_16, %c0_17] : memref<1x1xf32, #tpu.memory_space<smem>>
    memref.store %53, %arg4[%c0_16, %c0_17] : memref<1x1xf32, #tpu.memory_space<smem>>
    return
  }
}

</mosaic_0001>

<bundles_post_ra>
// kernel: tpu_custom_call.1
= control target key start
LH: loop header
LB: loop body
LE: loop exit
PB: predicated region body
PF: predicated region fallthrough
CT: control target
= control target key end

     0   :  { %10 = vsyncpa [#allocation3], 0  ;;  %v190_v1 = vmov 0   ;;  %s257_s0 = inlined_call_operand.vmem [shape: f32[8,2], index: 0, kind: input, shape index: {}]   ;;  %s258_s1 = inlined_call_operand.vmem [shape: f32[2,10], index: 1, kind: input, shape index: {}]   ;;  %s259_s2 = inlined_call_operand.vmem [shape: s32[8,1], index: 2, kind: input, shape index: {}]   ;;  %s260_s3 = inlined_call_operand.hbm [shape: f32[8,10], index: 3, kind: output, shape index: {0}]   ;;  %s261_s4 = inlined_call_operand.hbm [shape: f32[1,1], index: 4, kind: output, shape index: {1}]  }
   0x1   :  { %v18_v0 = vld [vmem:[%s257_s0] sm:$0xff]  ;;  %142 = vset.pattern.permute.xlu0 %v190_v1  ;;  %144 = vset.pattern.permute.xlu1 %v190_v1 }
   0x2   :  { %11 = vsyncpa [#allocation4], 0  ;;  %42 = vperm.xlu0 %142, %v18_v0   ;;  %v191_v2 = vmov 1   ;;  %v19_v3 = vld [vmem:[%s258_s1] sm:$0x3]  ;;  %v45_v16 = vlaneseq  ;;  %vm64_vm3 = vcmask 80896  }
   0x3   :  { %v21_v4 = vmul.f32 %v19_v3, %v19_v3  ;;  %v20_v32 = vld [vmem:[%s259_s2] sm:$0xff]  ;;  %v192_v38 = vmov 0.0   ;;  %vm91_vm5 = vcmask 7168   ;;  %s193_s2 = smov [#allocation2]  }
   0x4   :  { %v46_v18 = vshrl.u32 %v45_v16, 7  ;;  %v79_v35 = vand.u32 127, %v45_v16  ;;  %s113_s19 = sshll.u32 %s193_s2, 4  ;;  %s114_s19 = int_to_ptr.vmem [resolvable:$true] %s113_s19 }
   0x5   :  { %v23_v5 = vrot.slane %v21_v4, 1  ;;  %s154_s20 = scalar_lea.vmem %s114_s19, 128  ;;  %p159_p1 = scmp.lt.s32.totalorder %s114_s19, %s114_s19 }
   0x6   :  { %143 = vset.pattern.permute.xlu0 %v191_v2  ;;  %v47_v21 = vsub.s32 0, %v46_v18  ;;  %v60_v23 = vsub.s32 1, %v46_v18  ;;  %p155_p0 = scmp.ne.s32.totalorder %s114_s19, %s154_s20  ;;  %p160_p2 = scmp.lt.s32.totalorder %s154_s20, %s154_s20 }
   0x7   :  { %55 = vperm.xlu0 %143, %v18_v0   ;;  %v25_v6 = vadd.f32 %v23_v5, %v21_v4 }
   0x8   :  { %p161_p3 = por %p160_p2, %p159_p1 }
   0x9   :  { %146 = vrsqrt.f32 %v25_v6  ;;  %vm28_vm0 = vcmp.eq.f32.partialorder %v25_v6, inf  ;;  %v31_v9 = vand.u32 2147483648, %v25_v6  ;;  %vm30_vm1 = vcmp.eq.f32.partialorder %v25_v6, 0.0 }
   0xa   :  { %p162_p4 = pnand %p161_p3, %p155_p0 }
   0xb   :  { %145 = vset.pattern.permute.xlu0 %v190_v1 }
  0x13   :  { %v147_v7 = vpop.eup %146 }
  0x14   :  { %v27_v8 = vmul.f32 %v147_v7, %v25_v6 }
  0x16   :  { %v29_v10 = vsel %vm28_vm0, %v25_v6, %v27_v8 }
  0x17   :  { %v32_v11 = vsel %vm30_vm1, %v31_v9, %v29_v10 }
  0x18   :  { %v34_v12 = vadd.f32 1e-07, %v32_v11  ;;  %vm33_vm2 = vcmp.gt.f32.partialorder %v32_v11, 1e-05 }
  0x1a   :  { %148 = vrcp.f32 %v34_v12 }
  0x24   :  { %v149_v13 = vpop.eup %148 }
  0x25   :  { %v36_v14 = vmul.f32 1e-05, %v149_v13 }
  0x27   :  { %v37_v15 = vsel %vm33_vm2, %v36_v14, 1.0 }
  0x28   :  { %v38_v17 = vmul.f32 100000.0, %v37_v15 }
  0x2a   :  { %v51_v19 = vrot.slane %v38_v17, 7  ;;  %v39_v20 = vmul.f32 %v38_v17, %v19_v3 }
  0x2c   :  { %v53_v22 = vmul.f32 %v51_v19, %v19_v3  ;;  %v48_v25 = vrot.slane %v39_v20, %v47_v21 }
  0x2e   :  { %v61_v26 = vrot.slane %v53_v22, %v60_v23 }
  0x81   :  { %v43_v24 = vpop.permute.xlu0 %42 }
  0x82   :  { %v49_v28 = vmul.f32 %v48_v25, %v43_v24 }
  0x86   :  { %v56_v27 = vpop.permute.xlu0 %55 }
  0x87   :  { %v62_v29 = vmul.f32 %v61_v26, %v56_v27 }
  0x89   :  { %v63_v30 = vadd.f32 %v62_v29, %v49_v28 }
  0x8b   :  { %v66_v31 = vsel %vm64_vm3, %v63_v30, -inf  ;;  %65 = vst.msk [vmem:[#allocation2] sm:$0xff] %vm64_vm3, %v63_v30 }
  0x8c   :  { %67 = vmax.xlane.f32.xlu1 %v66_v31 }
  0x9d   :  { %81 = vperm.xlu1 %144, %v20_v32  }
 0x119   :  { %v68_v33 = vpop.xlane.xlu1 %67 }
 0x11a   :  { %v69_v34 = vsub.f32 %v63_v30, %v68_v33 }
 0x11c   :  { %v70_v36 = vmul.f32 1.442695, %v69_v34 }
 0x11d   :  { %v82_v37 = vpop.permute.xlu1 %81 }
 0x11e   :  { %150 = vpow2.f32 %v70_v36  ;;  %vm83_vm4 = vcmp.eq.s32.totalorder %v79_v35, %v82_v37 }
 0x11f   :  { %v134_v39 = vsel %vm83_vm4, 1.0, %v192_v38 }
 0x120   :  { %v86_v40 = vmul.f32 %v134_v39, %v63_v30 }
 0x122   :  { %v87_v41 = vsel %vm64_vm3, %v86_v40, 0.0 }
 0x123   :  { %88 = vadd.xlane.f32.xlu1 %v87_v41 }
 0x128   :  { %v151_v42 = vpop.eup %150 }
 0x129   :  { %v72_v43 = vsel %vm64_vm3, %v151_v42, 0.0 }
 0x12a   :  { %73 = vadd.xlane.f32.xlu0 %v72_v43 }
 0x1b0   :  { %v89_v48 = vpop.xlane.xlu1 %88 }
 0x1b7   :  { %v74_v44 = vpop.xlane.xlu0 %73 }
 0x1b8   :  { %152 = vlog2.f32 %v74_v44 }
 0x1c2   :  { %v153_v45 = vpop.eup %152 }
 0x1c3   :  { %v76_v46 = vmul.f32 0.6931472, %v153_v45 }
 0x1c5   :  { %v77_v47 = vadd.f32 %v76_v46, %v68_v33 }
 0x1c7   :  { %v90_v49 = vsub.f32 %v77_v47, %v89_v48 }
 0x1c9   :  { %v92_v50 = vsel %vm91_vm5, %v90_v49, 0.0 }
 0x1ca   :  { %93 = vadd.xlane.f32.xlu0 %v92_v50 }
 0x1cb   :  { %165 = shalt.err (!%p162_p4)
}
 0x1cc   :  { %s166_s23 = scalar_lea.hbm %s260_s3, 128 }
 0x1cd   :  { %p167_p5 = scmp.ne.s32.totalorder %s260_s3, %s166_s23  ;;  %p170_p6 = scmp.lt.u32.totalorder %s166_s23, %s260_s3 }
 0x1cf   :  { %p172_p7 = pnand %p170_p6, %p167_p5 }
 0x1d1   :  { %175 = shalt.err (!%p172_p7)
}
 0x1d2   :  { %116 = dma.vmem_to_hbm [thread:$0]  %s114_s19, 128, %s260_s3, [#allocation3]  }
 0x1d3   :  { %s176_s8 = scalar_lea.hbm %s261_s4, 16 }
 0x1d4   :  { %p177_p8 = scmp.ne.s32.totalorder %s261_s4, %s176_s8  ;;  %p180_p9 = scmp.lt.u32.totalorder %s176_s8, %s261_s4 }
 0x1d6   :  { %p182_p10 = pnand %p180_p9, %p177_p8 }
 0x257   :  { %v94_v51 = vpop.xlane.xlu0 %93 }
 0x258   :  { %v95_v52 = vrot.slane %v94_v51, 4 }
 0x25a   :  { %v96_v53 = vadd.f32 %v95_v52, %v94_v51 }
 0x25c   :  { %v97_v54 = vrot.slane %v96_v53, 2 }
 0x25e   :  { %v98_v55 = vadd.f32 %v97_v54, %v96_v53 }
 0x260   :  { %v99_v56 = vrot.slane %v98_v55, 1 }
 0x262   :  { %v100_v57 = vadd.f32 %v99_v56, %v98_v55 }
 0x264   :  { %135 = vpush %v100_v57 }
 0x295   :  { %s136_s30 = spop %135 }
 0x296   :  { %s104_s5 = smul.f32 0.125, %s136_s30 }
 0x298   :  { %106 = sst [smem:[#allocation5]] %s104_s5 }
 0x299   :  { %185 = shalt.err (!%p182_p10)
}
 0x29a   :  { %s194_s12 = smov [#allocation5]  }
 0x29b   :  { %124 = dma.smem_to_hbm %s194_s12, 16, %s261_s4, [#allocation4]  }
 0x29c   :  { %186 = dma.done.wait [#allocation3], 128  }
 0x29d   :  { %187 = vsyncadd [#allocation3], 4294967168 }
 0x29e   :  { %188 = dma.done.wait [#allocation4], 16  }
 0x29f   :  { %189 = vsyncadd [#allocation4], 4294967280 }
 0x2a0   :  { %131 = sfence }
 0x2a1   :  { %132 = vsyncpa [#allocation3], 1 }
 0x2a2   :  { %133 = vsyncpa [#allocation4], 1 }

</bundles_post_ra>
